<compile_context>
chip_gen: v7x
topology: tpu7x:2x2x1
jax: 0.10.0
libtpu: 0.0.40
codegen_flags: <defaults>
</compile_context>

<pallas_src>
import functools

import jax
import jax.numpy as jnp
from jax import lax
from jax.experimental import pallas as pl
from jax.experimental.pallas import tpu as pltpu


def _round_up(x, m):
    return ((x + m - 1) // m) * m


# ----------------------------------------------------------------------------
# Kernel
# ----------------------------------------------------------------------------
def _policy_kernel(x_ref, p_ref, out_ref, *, k1, n_valid):
    x = x_ref[...]                                            # (tile_m, k1), bias lane = 1.0

    # fc1 (+ bias folded in as row d_in of the slab) + relu
    w1b = p_ref[0, 0:k1, 0:128]                               # (k1, 128)
    h1 = jnp.maximum(
        jnp.dot(x, w1b, preferred_element_type=jnp.float32), 0.0)        # (tile_m, 128)

    # fc2 (output padded to 128 lanes, padded lanes are zero) + relu
    w2p = p_ref[0, k1:k1 + 128, 0:128]                        # (128, 128)
    b2 = p_ref[0, k1 + 128:k1 + 129, 0:128]                   # (1, 128)
    h2 = jnp.maximum(
        jnp.dot(h1, w2p, preferred_element_type=jnp.float32) + b2, 0.0)  # (tile_m, 128)

    # fc3[head] (head block selected by the BlockSpec index_map)
    w3 = p_ref[0, k1 + 136:k1 + 264, :]                       # (128, a_pad)
    b3 = p_ref[0, k1 + 264:k1 + 265, :]                       # (1, a_pad)
    logits = jnp.dot(h2, w3, preferred_element_type=jnp.float32) + b3    # (tile_m, a_pad)

    # masked softmax over the valid action lanes (n_valid is a static constant)
    lane = lax.broadcasted_iota(jnp.int32, logits.shape, 1)
    valid = lane < n_valid
    masked = jnp.where(valid, logits, -1e30)
    m = jnp.max(masked, axis=-1, keepdims=True)
    e = jnp.where(valid, jnp.exp(masked - m), 0.0)
    s = jnp.sum(e, axis=-1, keepdims=True)
    r = pl.reciprocal(s, approx=True)                         # EUP slot
    r = r * (2.0 - s * r)                                     # one Newton step -> full f32 precision
    out_ref[...] = e * r


# ----------------------------------------------------------------------------
# Jitted forward (static shapes + static head => compiled once per config)
# ----------------------------------------------------------------------------
@functools.partial(
    jax.jit,
    static_argnames=("space", "d_in", "k1", "a_pad", "head", "n_valid",
                     "b_pad", "tile_m"))
def _forward_jit(p, qinputs, *, space, d_in, k1, a_pad, head, n_valid,
                 b_pad, tile_m):
    batch = qinputs.shape[0]

    # augmented input slab: [q ..., float(dim_index), 1.0 (bias lane), 0 ...]
    x = jnp.zeros((b_pad, k1), jnp.float32)
    x = x.at[:batch, :space].set(qinputs.astype(jnp.float32))
    x = x.at[:batch, space].set(jnp.float32(head))
    x = x.at[:batch, d_in].set(1.0)
    x = x.astype(p.dtype)

    num_heads, rows, width = p.shape

    call = pl.pallas_call(
        functools.partial(_policy_kernel, k1=k1, n_valid=n_valid),
        out_shape=jax.ShapeDtypeStruct((b_pad, a_pad), jnp.float32),
        grid_spec=pltpu.PrefetchScalarGridSpec(
            num_scalar_prefetch=0,
            grid=(b_pad // tile_m,),
            in_specs=[
                pl.BlockSpec((tile_m, k1), lambda i: (i, 0)),              # x
                pl.BlockSpec((1, rows, width),
                             lambda i, _h=head: (_h, 0, 0)),               # packed params[head]
            ],
            out_specs=pl.BlockSpec((tile_m, a_pad), lambda i: (i, 0)),
        ),
        compiler_params=pltpu.CompilerParams(
            dimension_semantics=("parallel",)),
    )
    out = call(x, p)
    return out[:batch, :n_valid]


# ----------------------------------------------------------------------------
# Parameter init (PyTorch-Linear-like uniform bounds), packed for the kernel
# ----------------------------------------------------------------------------
def init_params(key, space_lenth, action_scale_list, dtype=jnp.float32):
    d_in = space_lenth + 1                      # fc1 input features
    k1 = _round_up(d_in + 1, 8)                 # +1 bias lane, padded to sublane multiple
    a_max = max(action_scale_list)
    a_pad = _round_up(a_max, 128)               # >= 128, lane-dense output width
    num_heads = len(action_scale_list)
    rows = k1 + 272                             # k1 | 128 (W2) | 8 (b2 pad) | 128 (W3) | 8 (b3 pad)

    ks = jax.random.split(key, 4 + 2 * num_heads)

    def uni(k, shape, fan_in):
        b = 1.0 / jnp.sqrt(jnp.float32(fan_in))
        return jax.random.uniform(k, shape, jnp.float32, -b, b)

    w1 = uni(ks[0], (d_in, 128), d_in)
    b1 = uni(ks[1], (128,), d_in)
    w2 = uni(ks[2], (128, 64), 128)
    b2 = uni(ks[3], (64,), 128)

    p = jnp.zeros((num_heads, rows, a_pad), jnp.float32)
    # shared fc1/fc2 rows replicated into each head's slab (tiny; one DMA/call)
    p = p.at[:, :d_in, :128].set(w1)
    p = p.at[:, d_in, :128].set(b1)
    p = p.at[:, k1:k1 + 128, :64].set(w2)
    p = p.at[:, k1 + 128, :64].set(b2)
    for h, a in enumerate(action_scale_list):
        w3 = uni(ks[4 + 2 * h], (64, a), 64)
        b3 = uni(ks[5 + 2 * h], (a,), 64)
        p = p.at[h, k1 + 136:k1 + 200, :a].set(w3)
        p = p.at[h, k1 + 264, :a].set(b3)

    # dtype=jnp.bfloat16 halves weight DMA bytes (useful on v5e); default f32.
    return dict(p=p.astype(dtype), d_in=d_in, k1=k1, a_pad=a_pad,
                num_heads=num_heads, dtype=dtype)


# ----------------------------------------------------------------------------
# Forward wrappers
# ----------------------------------------------------------------------------
def _pad_batch(batch):
    b_pad = max(8, _round_up(batch, 8))
    if b_pad > 256:
        b_pad = _round_up(b_pad, 256)
        tile_m = 256
    else:
        tile_m = b_pad
    return b_pad, tile_m


def _clamp_head(params, dimension_index):
    head = int(dimension_index)
    return max(0, min(head, params["num_heads"] - 1))   # clamp: no OOB head


def mlp_policy_forward(params, action_scale_list, qfunction_input, dimension_index):
    """Single state (matches the PyTorch forward signature)."""
    head = _clamp_head(params, dimension_index)
    a = int(action_scale_list[head])
    q = jnp.asarray(qfunction_input, jnp.float32)[None, :]
    b_pad, tile_m = _pad_batch(1)
    out = _forward_jit(params["p"], q,
                       space=params["d_in"] - 1, d_in=params["d_in"],
                       k1=params["k1"], a_pad=params["a_pad"],
                       head=head, n_valid=a, b_pad=b_pad, tile_m=tile_m)
    return out[0]


def mlp_policy_forward_batch(params, action_scale_list, qinputs, dimension_index):
    """Multiple states, same head, one kernel call: qinputs (B, space_lenth) -> (B, action_scale)."""
    head = _clamp_head(params, dimension_index)
    a = int(action_scale_list[head])
    qinputs = jnp.asarray(qinputs, jnp.float32)
    b_pad, tile_m = _pad_batch(qinputs.shape[0])
    return _forward_jit(params["p"], qinputs,
                        space=params["d_in"] - 1, d_in=params["d_in"],
                        k1=params["k1"], a_pad=params["a_pad"],
                        head=head, n_valid=a, b_pad=b_pad, tile_m=tile_m)


# ----------------------------------------------------------------------------
# Pure-JAX reference (mirrors the PyTorch module exactly; padded entries are 0)
# ----------------------------------------------------------------------------
def _reference_forward(params, action_scale_list, qinputs, dimension_index):
    d_in, k1 = params["d_in"], params["k1"]
    space = d_in - 1
    batch = qinputs.shape[0]
    x = jnp.zeros((batch, k1), jnp.float32)
    x = x.at[:, :space].set(qinputs.astype(jnp.float32))
    x = x.at[:, space].set(float(dimension_index))
    x = x.at[:, d_in].set(1.0)
    p = params["p"].astype(jnp.float32)[dimension_index]
    h1 = jnp.maximum(x @ p[:k1, :128], 0.0)
    h2 = jnp.maximum(h1 @ p[k1:k1 + 128, :128] + p[k1 + 128, :128], 0.0)
    a = action_scale_list[dimension_index]
    logits = h2 @ p[k1 + 136:k1 + 264, :a] + p[k1 + 264, :a]
    return jax.nn.softmax(logits, axis=-1)


if __name__ == "__main__":
    space_lenth = 7                    # -> fc1 input dim 8
    action_scale_list = [6, 4, 10]     # three heads with different action scales
    dimension_index = 2

    key = jax.random.PRNGKey(0)
    pkey, xkey = jax.random.split(key)
    params = init_params(pkey, space_lenth, action_scale_list)

    # single-state path (PyTorch-equivalent call)
    q = jax.random.normal(xkey, (space_lenth,), jnp.float32)
    probs = mlp_policy_forward(params, action_scale_list, q, dimension_index)
    probs = jax.block_until_ready(probs)
    ref = _reference_forward(params, action_scale_list, q[None, :], dimension_index)[0]
    assert probs.shape == (action_scale_list[dimension_index],)
    assert jnp.allclose(probs, ref, atol=1e-5, rtol=1e-5), (probs, ref)
    assert jnp.isclose(jnp.sum(probs), 1.0, atol=1e-5)

    # batched path: several states, same head, one kernel call
    B = 8
    qb = jax.random.normal(jax.random.PRNGKey(1), (B, space_lenth), jnp.float32)
    probs_b = mlp_policy_forward_batch(params, action_scale_list, qb, 1)
    probs_b = jax.block_until_ready(probs_b)
    ref_b = _reference_forward(params, action_scale_list, qb, 1)
    assert probs_b.shape == (B, action_scale_list[1])
    assert jnp.allclose(probs_b, ref_b, atol=1e-5, rtol=1e-5), (probs_b, ref_b)

    print("KERNEL_OK")
</pallas_src>

<mosaic_0001>
module attributes {stable_mosaic.version = 11 : i64} {
  func.func @_policy_kernel(%arg0: i32, %arg1: memref<8x16xf32, #tpu.memory_space<vmem>>, %arg2: memref<1x288x128xf32, #tpu.memory_space<vmem>>, %arg3: memref<8x128xf32, #tpu.memory_space<vmem>>) attributes {dimension_semantics = [#tpu.dimension_semantics<parallel>], iteration_bounds = array<i64: 1>, scalar_prefetch = 0 : i64, scratch_operands = 0 : i64, tpu.core_type = #tpu.core_type<tc>, window_params = [{transform_indices = @transform_0, window_bounds = array<i64: 8, 16>}, {transform_indices = @transform_1, window_bounds = array<i64: 1, 288, 128>}, {transform_indices = @transform_2, window_bounds = array<i64: 8, 128>}]} {
    %c0 = arith.constant 0 : index
    %c0_0 = arith.constant 0 : index
    %0 = vector.load %arg1[%c0, %c0_0] : memref<8x16xf32, #tpu.memory_space<vmem>>, vector<8x16xf32>
    %c0_1 = arith.constant 0 : index
    %c0_2 = arith.constant 0 : index
    %c0_3 = arith.constant 0 : index
    %1 = vector.load %arg2[%c0_1, %c0_2, %c0_3] : memref<1x288x128xf32, #tpu.memory_space<vmem>>, vector<1x16x128xf32>
    %2 = vector.shape_cast %1 : vector<1x16x128xf32> to vector<16x128xf32>
    %cst = arith.constant dense<0.000000e+00> : vector<8x128xf32>
    %3 = tpu.matmul %0, %2, %cst {dimension_numbers = #tpu.dot_dimension_numbers<[1], [0], [0], [1], [0, 0, 1, 1], [], []>} : vector<8x16xf32>, vector<16x128xf32>, vector<8x128xf32> -> vector<8x128xf32>
    %cst_4 = arith.constant 0.000000e+00 : f32
    %4 = vector.broadcast %cst_4 : f32 to vector<8x128xf32>
    %5 = arith.maximumf %3, %4 : vector<8x128xf32>
    %c0_5 = arith.constant 0 : index
    %c16 = arith.constant 16 : index
    %c0_6 = arith.constant 0 : index
    %6 = vector.load %arg2[%c0_5, %c16, %c0_6] : memref<1x288x128xf32, #tpu.memory_space<vmem>>, vector<1x128x128xf32>
    %7 = vector.shape_cast %6 : vector<1x128x128xf32> to vector<128x128xf32>
    %c0_7 = arith.constant 0 : index
    %c144 = arith.constant 144 : index
    %c0_8 = arith.constant 0 : index
    %8 = vector.load %arg2[%c0_7, %c144, %c0_8] : memref<1x288x128xf32, #tpu.memory_space<vmem>>, vector<1x1x128xf32>
    %9 = vector.shape_cast %8 : vector<1x1x128xf32> to vector<1x128xf32>
    %cst_9 = arith.constant dense<0.000000e+00> : vector<8x128xf32>
    %10 = tpu.matmul %5, %7, %cst_9 {dimension_numbers = #tpu.dot_dimension_numbers<[1], [0], [0], [1], [0, 0, 1, 1], [], []>} : vector<8x128xf32>, vector<128x128xf32>, vector<8x128xf32> -> vector<8x128xf32>
    %11 = vector.broadcast %9 : vector<1x128xf32> to vector<8x128xf32>
    %12 = arith.addf %10, %11 : vector<8x128xf32>
    %cst_10 = arith.constant 0.000000e+00 : f32
    %13 = vector.broadcast %cst_10 : f32 to vector<8x128xf32>
    %14 = arith.maximumf %12, %13 : vector<8x128xf32>
    %c0_11 = arith.constant 0 : index
    %c152 = arith.constant 152 : index
    %c0_12 = arith.constant 0 : index
    %15 = vector.load %arg2[%c0_11, %c152, %c0_12] : memref<1x288x128xf32, #tpu.memory_space<vmem>>, vector<1x128x128xf32>
    %16 = vector.shape_cast %15 : vector<1x128x128xf32> to vector<128x128xf32>
    %c0_13 = arith.constant 0 : index
    %c280 = arith.constant 280 : index
    %c0_14 = arith.constant 0 : index
    %17 = vector.load %arg2[%c0_13, %c280, %c0_14] : memref<1x288x128xf32, #tpu.memory_space<vmem>>, vector<1x1x128xf32>
    %18 = vector.shape_cast %17 : vector<1x1x128xf32> to vector<1x128xf32>
    %cst_15 = arith.constant dense<0.000000e+00> : vector<8x128xf32>
    %19 = tpu.matmul %14, %16, %cst_15 {dimension_numbers = #tpu.dot_dimension_numbers<[1], [0], [0], [1], [0, 0, 1, 1], [], []>} : vector<8x128xf32>, vector<128x128xf32>, vector<8x128xf32> -> vector<8x128xf32>
    %20 = vector.broadcast %18 : vector<1x128xf32> to vector<8x128xf32>
    %21 = arith.addf %19, %20 : vector<8x128xf32>
    %22 = tpu.iota {dimensions = array<i32: 1>} : vector<8x128xi32>
    %c10_i32 = arith.constant 10 : i32
    %23 = vector.broadcast %c10_i32 : i32 to vector<8x128xi32>
    %24 = arith.cmpi slt, %22, %23 : vector<8x128xi32>
    %cst_16 = arith.constant -1.000000e+30 : f32
    %25 = vector.broadcast %cst_16 : f32 to vector<8x128xf32>
    %26 = arith.select %24, %21, %25 : vector<8x128xi1>, vector<8x128xf32>
    %cst_17 = arith.constant dense<0xFF800000> : vector<8xf32>
    %27 = vector.multi_reduction <maximumf>, %26, %cst_17 [1] : vector<8x128xf32> to vector<8xf32>
    %28 = vector.shape_cast %27 : vector<8xf32> to vector<8x1xf32>
    %29 = vector.broadcast %28 : vector<8x1xf32> to vector<8x128xf32>
    %30 = arith.subf %26, %29 : vector<8x128xf32>
    %31 = math.exp %30 : vector<8x128xf32>
    %cst_18 = arith.constant 0.000000e+00 : f32
    %32 = vector.broadcast %cst_18 : f32 to vector<8x128xf32>
    %33 = arith.select %24, %31, %32 : vector<8x128xi1>, vector<8x128xf32>
    %cst_19 = arith.constant dense<0.000000e+00> : vector<8xf32>
    %34 = vector.multi_reduction <add>, %33, %cst_19 [1] : vector<8x128xf32> to vector<8xf32>
    %35 = vector.shape_cast %34 : vector<8xf32> to vector<8x1xf32>
    %36 = tpu.reciprocal %35 {approx = true} : vector<8x1xf32> -> vector<8x1xf32>
    %37 = arith.mulf %35, %36 : vector<8x1xf32>
    %cst_20 = arith.constant 2.000000e+00 : f32
    %38 = vector.broadcast %cst_20 : f32 to vector<8x1xf32>
    %39 = arith.subf %38, %37 : vector<8x1xf32>
    %40 = arith.mulf %36, %39 : vector<8x1xf32>
    %41 = vector.broadcast %40 : vector<8x1xf32> to vector<8x128xf32>
    %42 = arith.mulf %33, %41 : vector<8x128xf32>
    %c0_21 = arith.constant 0 : index
    %c0_22 = arith.constant 0 : index
    %43 = vector.load %arg3[%c0_21, %c0_22] : memref<8x128xf32, #tpu.memory_space<vmem>>, vector<8x128xf32>
    tpu.vector_store %arg3[%c0_21, %c0_22], %42 {strides = array<i32>} : memref<8x128xf32, #tpu.memory_space<vmem>>, vector<8x128xf32>,
    return
  }
  func.func @transform_0(%arg0: i32) -> (i32, i32) {
    %c0_i32 = arith.constant 0 : i32
    %c0_i32_0 = arith.constant 0 : i32
    return %arg0, %c0_i32 : i32, i32
  }
  func.func @transform_1(%arg0: i32) -> (i32, i32, i32) {
    %c2_i32 = arith.constant 2 : i32
    %c0_i32 = arith.constant 0 : i32
    %c0_i32_0 = arith.constant 0 : i32
    %c0_i32_1 = arith.constant 0 : i32
    return %c2_i32, %c0_i32, %c0_i32_0 : i32, i32, i32
  }
  func.func @transform_2(%arg0: i32) -> (i32, i32) {
    %c0_i32 = arith.constant 0 : i32
    %c0_i32_0 = arith.constant 0 : i32
    return %arg0, %c0_i32 : i32, i32
  }
}

</mosaic_0001>

<bundles_post_ra>
// kernel: _forward_jit.1
= control target key start
LH: loop header
LB: loop body
LE: loop exit
PB: predicated region body
PF: predicated region fallthrough
CT: control target
= control target key end

     0   :  { %7 = vsyncpa [#allocation3], 0  ;;  %s515_s12 = smov [#allocation2]   ;;  %s571_s0 = inlined_call_operand.vmem [shape: f32[8,16], index: 0, kind: input, shape index: {}]   ;;  %s572_s1 = inlined_call_operand.hbm [shape: f32[3,288,128], index: 1, kind: input, shape index: {}]   ;;  %s573_s2 = inlined_call_operand.vmem [shape: f32[8,128], index: 2, kind: output, shape index: {}]  }
   0x1   :  { %s15_s11 = scalar_lea.hbm %s572_s1, 9216  ;;  %s16_s13 = sshll.u32 %s515_s12, 4  ;;  %s17_s13 = int_to_ptr.vmem [resolvable:$true] %s16_s13 }
   0x2   :  { %s512_s16 = scalar_lea.hbm %s572_s1, 13824  ;;  %p491_p1 = scmp.lt.u32.totalorder %s15_s11, %s572_s1 }
   0x3   :  { %p489_p0 = scmp.ne.s32.totalorder %s15_s11, %s512_s16  ;;  %p492_p2 = scmp.lt.u32.totalorder %s512_s16, %s512_s16 }
   0x4   :  { %p494_p4 = scmp.lt.u32.totalorder %s512_s16, %s15_s11 }
   0x5   :  { %p493_p3 = por %p492_p2, %p491_p1 }
   0x7   :  { %p495_p5 = por %p494_p4, %p493_p3 }
   0x9   :  { %p496_p6 = pnand %p495_p5, %p489_p0 }
   0xb   :  { %499 = shalt.err (!%p496_p6)
}
   0xc   :  { %s500_s19 = scalar_lea.vmem %s17_s13, 4608  ;;  %p505_p8 = scmp.lt.s32.totalorder %s17_s13, %s17_s13 }
   0xd   :  { %p501_p7 = scmp.ne.s32.totalorder %s17_s13, %s500_s19  ;;  %p506_p9 = scmp.lt.s32.totalorder %s500_s19, %s500_s19 }
   0xf   :  { %p507_p10 = por %p506_p9, %p505_p8 }
  0x11   :  { %p508_p11 = pnand %p507_p10, %p501_p7 }
  0x13   :  { %511 = shalt.err (!%p508_p11)
}
  0x14   :  { %s516_s20 = smov 128   ;;  %s517_s21 = smov 8  }
  0x15   :  { %22 = dma.hbm_to_vmem [thread:$0]  %s15_s11, 4608, %s17_s13, [#allocation3], %s516_s20, %s516_s20, %s517_s21  }
  0x16   :  { %513 = dma.done.wait [#allocation3], 4608  }
  0x17   :  { %514 = vsyncadd [#allocation3], 4294962688  ;;  %v518_v0 = vmov 0.0|0.0   ;;  %vm519_vm0 = vmmov 0   ;;  %v520_v1 = vmov 0.0   ;;  %v27_v2 = vld [vmem:[#allocation2] sm:$0xff]  ;;  %v287_v62 = vlaneseq }
  0x18   :  { %427 = vmatprep.subr.bf16.mxu0 %v518_v0  ;;  %354 = vmatprep.mubr.msk.f32.mxu0 %vm519_vm0, %v520_v1  ;;  %v28_v3 = vld [vmem:[#allocation2 + $0x8] sm:$0xff]  ;;  %v104_v5 = vld [vmem:[#allocation2 + $0x10] sm:$0xff]  ;;  %v105_v6 = vld [vmem:[#allocation2 + $0x18] sm:$0xff]  ;;  %vm29_vm1 = vcmask 130048  }
  0x19   :  { %430 = vmatprep.subr.bf16.mxu1 %v518_v0  ;;  %389 = vmatprep.mubr.msk.f32.mxu1 %vm519_vm0, %v520_v1  ;;  %v428_v4 = vpack.c.bf16 %v28_v3, %v27_v2  ;;  %v106_v7 = vld [vmem:[#allocation2 + $0x20] sm:$0xff]  ;;  %v431_v8 = vpack.c.bf16 %v105_v6, %v104_v5  ;;  %v107_v9 = vld [vmem:[#allocation2 + $0x28] sm:$0xff]  ;;  %v108_v12 = vld [vmem:[#allocation2 + $0x30] sm:$0xff]  ;;  %v288_v63 = vand.u32 127, %v287_v62 }
  0x1a   :  { %v26_v10 = vld [vmem:[%s571_s0] sm:$0xff]  ;;  %v434_v11 = vpack.c.bf16 %v107_v9, %v106_v7  ;;  %v109_v13 = vld [vmem:[#allocation2 + $0x38] sm:$0xff]  ;;  %v111_v16 = vld [vmem:[#allocation2 + $0x48] sm:$0xff] }
  0x1b   :  { %429 = vmatpush3.bf16.msra.mxu0 %v428_v4  ;;  %432 = vmatpush3.bf16.msra.mxu1 %v431_v8  ;;  %v437_v14 = vpack.c.bf16 %v109_v13, %v108_v12  ;;  %v110_v15 = vld [vmem:[#allocation2 + $0x40] sm:$0xff]  ;;  %v112_v18 = vld [vmem:[#allocation2 + $0x50] sm:$0xff]  ;;  %v113_v19 = vld [vmem:[#allocation2 + $0x58] sm:$0xff]  ;;  %vm289_vm2 = vcmp.lt.s32.totalorder %v288_v63, 10 }
  0x1c   :  { %454 = vmatprep.subr.bf16.mxu0 %v518_v0  ;;  %433 = vmatprep.subr.bf16.mxu1 %v518_v0  ;;  %v440_v17 = vpack.c.bf16 %v111_v16, %v110_v15  ;;  %v443_v20 = vpack.c.bf16 %v113_v19, %v112_v18  ;;  %v114_v21 = vld [vmem:[#allocation2 + $0x60] sm:$0xff]  ;;  %v115_v22 = vld [vmem:[#allocation2 + $0x68] sm:$0xff]  ;;  %v116_v24 = vld [vmem:[#allocation2 + $0x70] sm:$0xff] }
  0x1d   :  { %v446_v23 = vpack.c.bf16 %v115_v22, %v114_v21  ;;  %v117_v25 = vld [vmem:[#allocation2 + $0x78] sm:$0xff]  ;;  %v118_v27 = vld [vmem:[#allocation2 + $0x80] sm:$0xff]  ;;  %v119_v28 = vld [vmem:[#allocation2 + $0x88] sm:$0xff] }
  0x1e   :  { %355 = vmatmul.mubr.msk.f32.vlgmr.msra.gmra.mrb[0].mxu0 %vm29_vm1, %v26_v10  ;;  %v449_v26 = vpack.c.bf16 %v117_v25, %v116_v24  ;;  %v452_v29 = vpack.c.bf16 %v119_v28, %v118_v27  ;;  %v196_v30 = vld [vmem:[#allocation2 + $0x98] sm:$0xff]  ;;  %v197_v31 = vld [vmem:[#allocation2 + $0xa0] sm:$0xff]  ;;  %v198_v32 = vld [vmem:[#allocation2 + $0xa8] sm:$0xff] }
  0x1f   :  { %424 = vmatprep.mubr.msk.f32.mxu0 %vm519_vm0, %v520_v1  ;;  %435 = vmatpush3.bf16.msra.mxu1 %v434_v11  ;;  %v455_v33 = vpack.c.bf16 %v197_v31, %v196_v30  ;;  %v199_v34 = vld [vmem:[#allocation2 + $0xb0] sm:$0xff]  ;;  %v200_v36 = vld [vmem:[#allocation2 + $0xb8] sm:$0xff]  ;;  %v201_v37 = vld [vmem:[#allocation2 + $0xc0] sm:$0xff] }
  0x20   :  { %436 = vmatprep.subr.bf16.mxu1 %v518_v0  ;;  %v458_v35 = vpack.c.bf16 %v199_v34, %v198_v32  ;;  %v461_v38 = vpack.c.bf16 %v201_v37, %v200_v36  ;;  %v202_v39 = vld [vmem:[#allocation2 + $0xc8] sm:$0xff]  ;;  %v203_v40 = vld [vmem:[#allocation2 + $0xd0] sm:$0xff]  ;;  %v204_v42 = vld [vmem:[#allocation2 + $0xd8] sm:$0xff] }
  0x21   :  { %456 = vmatpush3.bf16.msra.mxu0 %v455_v33  ;;  %v464_v41 = vpack.c.bf16 %v203_v40, %v202_v39  ;;  %v205_v43 = vld [vmem:[#allocation2 + $0xe0] sm:$0xff]  ;;  %v206_v45 = vld [vmem:[#allocation2 + $0xe8] sm:$0xff]  ;;  %v207_v46 = vld [vmem:[#allocation2 + $0xf0] sm:$0xff] }
  0x22   :  { %457 = vmatprep.subr.bf16.mxu0 %v518_v0  ;;  %v467_v44 = vpack.c.bf16 %v205_v43, %v204_v42  ;;  %v470_v47 = vpack.c.bf16 %v207_v46, %v206_v45  ;;  %v208_v48 = vld [vmem:[#allocation2 + $0xf8] sm:$0xff]  ;;  %v209_v49 = vld [vmem:[#allocation2 + $0x100] sm:$0xff]  ;;  %v210_v54 = vld [vmem:[#allocation2 + $0x108] sm:$0xff] }
  0x23   :  { %438 = vmatpush3.bf16.msra.mxu1 %v437_v14  ;;  %v473_v50 = vpack.c.bf16 %v209_v49, %v208_v48  ;;  %v211_v55 = vld [vmem:[#allocation2 + $0x110] sm:$0xff]  ;;  %v312_v1 = vld [vmem:[#allocation2 + $0x118] ss:$0 sm:$0xff] }
  0x24   :  { %439 = vmatprep.subr.bf16.mxu1 %v518_v0  ;;  %v476_v56 = vpack.c.bf16 %v211_v55, %v210_v54  ;;  %v311_v57 = vld [vmem:[#allocation2 + $0x90] ss:$0 sm:$0xff] }
  0x25   :  { %459 = vmatpush3.bf16.msra.mxu0 %v458_v35 }
  0x26   :  { %460 = vmatprep.subr.bf16.mxu0 %v518_v0 }
  0x27   :  { %441 = vmatpush3.bf16.msra.mxu1 %v440_v17 }
  0x28   :  { %442 = vmatprep.subr.bf16.mxu1 %v518_v0 }
  0x29   :  { %462 = vmatpush3.bf16.msra.mxu0 %v461_v38 }
  0x2a   :  { %463 = vmatprep.subr.bf16.mxu0 %v518_v0 }
  0x2b   :  { %444 = vmatpush3.bf16.msra.mxu1 %v443_v20 }
  0x2c   :  { %445 = vmatprep.subr.bf16.mxu1 %v518_v0 }
  0x2d   :  { %465 = vmatpush3.bf16.msra.mxu0 %v464_v41 }
  0x2e   :  { %466 = vmatprep.subr.bf16.mxu0 %v518_v0 }
  0x2f   :  { %447 = vmatpush3.bf16.msra.mxu1 %v446_v23 }
  0x30   :  { %448 = vmatprep.subr.bf16.mxu1 %v518_v0 }
  0x31   :  { %468 = vmatpush3.bf16.msra.mxu0 %v467_v44 }
  0x32   :  { %469 = vmatprep.subr.bf16.mxu0 %v518_v0 }
  0x33   :  { %450 = vmatpush3.bf16.msra.mxu1 %v449_v26 }
  0x34   :  { %451 = vmatprep.subr.bf16.mxu1 %v518_v0 }
  0x35   :  { %471 = vmatpush3.bf16.msra.mxu0 %v470_v47 }
  0x36   :  { %472 = vmatprep.subr.bf16.mxu0 %v518_v0 }
  0x37   :  { %453 = vmatpush3.bf16.msra.mxu1 %v452_v29 }
  0x39   :  { %474 = vmatpush3.bf16.msra.mxu0 %v473_v50 }
  0x3a   :  { %475 = vmatprep.subr.bf16.mxu0 %v518_v0 }
  0x3d   :  { %477 = vmatpush3.bf16.msra.mxu0 %v476_v56 }
  0xf1   :  { %v99_v51 = vpop.f32.mrb[0].mxu0 }
  0xf2   :  { %v103_v52 = vmax.f32 %v99_v51, 0.0  ;;  %v356_v53 = vpop.f32.mrb[1].mxu0 }
  0xf4   :  { %390 = vmatmul.mubr.f32.vlgmr.msra.gmra.mrb[0].mxu1 %v103_v52 }
 0x1c7   :  { %v191_v58 = vpop.f32.mrb[0].mxu1 }
 0x1c8   :  { %v192_v59 = vadd.f32 %v311_v57, %v191_v58  ;;  %v391_v60 = vpop.f32.mrb[1].mxu1 }
 0x1ca   :  { %v195_v61 = vmax.f32 %v192_v59, 0.0 }
 0x1cc   :  { %425 = vmatmul.mubr.f32.vlgmr.msra.gmra.mrb[2].mxu0 %v195_v61 }
 0x29f   :  { %v283_v2 = vpop.f32.mrb[2].mxu0 }
 0x2a0   :  { %v284_v0 = vadd.f32 %v312_v1, %v283_v2  ;;  %v426_v3 = vpop.f32.mrb[3].mxu0 }
 0x2a2   :  { %v290_v4 = vsel %vm289_vm2, %v284_v0, -1e+30 }
 0x2a3   :  { %291 = vmax.xlane.f32.xlu0 %v290_v4 }
 0x330   :  { %v292_v5 = vpop.xlane.xlu0 %291 }
 0x331   :  { %v293_v6 = vsub.f32 %v290_v4, %v292_v5 }
 0x333   :  { %v294_v7 = vmul.f32 1.442695, %v293_v6 }
 0x335   :  { %484 = vpow2.f32 %v294_v7 }
 0x33f   :  { %v485_v8 = vpop.eup %484 }
 0x340   :  { %v296_v9 = vsel %vm289_vm2, %v485_v8, 0.0 }
 0x341   :  { %297 = vadd.xlane.f32.xlu0 %v296_v9 }
 0x3ce   :  { %v298_v10 = vpop.xlane.xlu0 %297 }
 0x3cf   :  { %486 = vrcp.f32 %v298_v10 }
 0x3d9   :  { %v487_v11 = vpop.eup %486 }
 0x3da   :  { %v300_v12 = vmul.f32 %v487_v11, %v298_v10 }
 0x3dc   :  { %v301_v13 = vsub.f32 2.0, %v300_v12 }
 0x3de   :  { %v302_v14 = vmul.f32 %v487_v11, %v301_v13 }
 0x3e0   :  { %v303_v15 = vmul.f32 %v302_v14, %v296_v9 }
 0x3e2   :  { %304 = vst [vmem:[%s573_s2] sm:$0xff] %v303_v15 }
 0x3e3   :  { %309 = vsyncpa [#allocation3], 1 }

</bundles_post_ra>
